<compile_context>
chip_gen: v6e
topology: v6e:2x2x1
jax: 0.10.0
libtpu: 0.0.40
codegen_flags: <defaults>
</compile_context>

<pallas_src>
import math
import re

import jax
import jax.numpy as jnp
from jax import lax
from jax.experimental import pallas as pl
from jax.experimental.pallas import tpu as pltpu


def _self_attention_kernel(x_ref, wqkv_ref, bqkv_ref, gamma_ref, beta_ref, o_ref):
    # x_ref block: (Bt, S, D) -> a block of batch elements per grid step
    Bt, S, D = x_ref.shape
    Dp = gamma_ref.shape[1]              # lane-padded feature width (multiple of 128)
    inv_sqrt_dk = 1.0 / math.sqrt(D)     # dk == dhid == D (NOT the padded Dp)

    # ---- fused Q/K/V projection: one bf16 MXU matmul, M = Bt*S, N = 3*Dp ----
    x2d = x_ref[...].reshape(Bt * S, D).astype(jnp.bfloat16)
    qkv = jnp.dot(x2d, wqkv_ref[...], preferred_element_type=jnp.float32)
    qkv = (qkv + bqkv_ref[...]).reshape(Bt, S, 3 * Dp)

    # Lane-tile-aligned split: each segment starts at a multiple of 128 lanes.
    # Padded lanes are exactly zero (zero weight columns + zero bias), so the
    # contractions below are unchanged by the padding.
    q = qkv[..., 0 * Dp:1 * Dp].astype(jnp.bfloat16)
    k = qkv[..., 1 * Dp:2 * Dp].astype(jnp.bfloat16)
    v = qkv[..., 2 * Dp:3 * Dp].astype(jnp.bfloat16)

    # scores[b,i,j] = q[b,i,:] . k[b,j,:] -- contract last dims, no explicit k.T
    scores = lax.dot_general(q, k, (((2,), (2,)), ((0,), (0,))),
                             preferred_element_type=jnp.float32)   # (Bt, Sq, Sk)

    # PyTorch quirk: softmax over the QUERY axis (dim=1), 1/sqrt(dk) AFTER the
    # softmax -- folded into the (small) reciprocal of the denominator.
    m = jnp.max(scores, axis=1, keepdims=True)                     # (Bt, 1, Sk)
    e = jnp.exp(scores - m)                                        # EUP
    denom = jnp.sum(e, axis=1, keepdims=True)                      # (Bt, 1, Sk)
    attn = e * (pl.reciprocal(denom, approx=True) * inv_sqrt_dk)   # (Bt, Sq, Sk)

    # attention @ V (bf16 inputs, f32 accumulation)
    selfatt = lax.dot_general(attn.astype(jnp.bfloat16), v,
                              (((2,), (1,)), ((0,), (0,))),
                              preferred_element_type=jnp.float32)  # (Bt, Sq, Dp)

    # LayerNorm over the REAL feature width D (padded lanes of selfatt are 0).
    mean = jnp.sum(selfatt, axis=-1, keepdims=True) * (1.0 / D)
    diff = selfatt - mean
    if D != Dp:
        lane = lax.broadcasted_iota(jnp.int32, (1, 1, Dp), 2)
        diff = diff * (lane < D).astype(selfatt.dtype)             # zero padded lanes
    var = jnp.sum(diff * diff, axis=-1, keepdims=True) * (1.0 / D)
    ln = diff * lax.rsqrt(var + 1e-5) * gamma_ref[...] + beta_ref[...]

    # sum over seq, divide by seq_len -> one lane-dense (Bt, Dp) slab per step
    ctx = jnp.sum(ln, axis=1) * (1.0 / S)                          # (Bt, Dp)
    o_ref[0] = ctx.astype(o_ref.dtype)


def _chip_version():
    """Best-effort TPU generation from device_kind (fallback: v6-class)."""
    try:
        kind = jax.devices()[0].device_kind  # e.g. "TPU v5 lite", "TPU v6e", "TPU7x"
        m = re.search(r"(\d+)", kind)
        if m:
            return int(m.group(1))
    except Exception:
        pass
    return 6


def _pick_block_b(B, S, m_target, cores):
    """Largest batch block with Bt*S <= m_target; balance grid steps across cores."""
    cap = max(1, m_target // S)
    divisors = [d for d in range(1, B + 1) if B % d == 0]
    fit = [d for d in divisors if d <= cap]
    if not fit:
        return 1
    if cores <= 1 or B == 1:
        return max(fit)                               # 1 TC: fewest grid steps wins
    balanced = [d for d in fit if (B // d) % cores == 0]
    if balanced:
        return max(balanced)                          # even step count across TCs
    multi = [d for d in fit if (B // d) >= cores]
    return max(multi) if multi else max(fit)


def _vmem_limit_bytes(block_b, S, D, Dp):
    f32, bf16 = 4, 2
    est = (
        2 * block_b * S * D * f32          # double-buffered input block
        + 2 * D * 3 * Dp * bf16            # fused bf16 weight (worst case 2 bufs)
        + 2 * 5 * Dp * f32                 # bias / gamma / beta
        + block_b * S * 3 * Dp * f32       # qkv
        + 3 * block_b * S * S * f32        # scores / exp / attn temporaries
        + 3 * block_b * S * Dp * f32       # selfatt / diff / ln temporaries
        + 2 * block_b * Dp * f32           # double-buffered output block
    )
    # Generous headroom, but stay within the smallest scoped default (v7x: 32 MiB).
    return int(min(max(8 * est, 16 << 20), 32 << 20))


def self_attention_transformer_v1(inp, lens, params, *, block_b=None):
    """inp: (B, S, D) float32; lens is unused (matches the PyTorch module)."""
    del lens  # unused in the reference forward
    B, S, D = inp.shape
    wq, bq, wk, bk, wv, bv, gamma, beta = params

    # Pad each Q/K/V segment to a 128-lane multiple so lane slices in the kernel
    # are tile-aligned and the output store is lane-dense.  Padding is zeros.
    Dp = ((D + 127) // 128) * 128
    pad = Dp - D
    pad_w = lambda w: jnp.pad(w, ((0, 0), (0, pad)))
    pad_v = lambda v: jnp.pad(v, (0, pad))

    wqkv = jnp.concatenate([pad_w(wq), pad_w(wk), pad_w(wv)], axis=1)      # (D, 3*Dp)
    wqkv = wqkv.astype(jnp.bfloat16)                                       # bf16 MXU operand
    bqkv = jnp.concatenate([pad_v(bq), pad_v(bk), pad_v(bv)]).reshape(1, 3 * Dp)
    bqkv = bqkv.astype(jnp.float32)
    g2 = pad_v(gamma).reshape(1, Dp).astype(jnp.float32)
    be2 = pad_v(beta).reshape(1, Dp).astype(jnp.float32)

    ver = _chip_version()
    m_target = 256 if ver >= 6 else 128   # MXU height: 256 on v6e/v7x, 128 on v5e
    cores = 2 if ver >= 7 else 1          # v7x: 2 TensorCores share the "parallel" axis

    if block_b is None:
        block_b = _pick_block_b(B, S, m_target, cores)
    assert B % block_b == 0, "block_b must divide the batch size"
    nb = B // block_b

    vmem_limit = _vmem_limit_bytes(block_b, S, D, Dp)

    def run(single_buffer_weights):
        def const_spec(shape):
            idx = lambda b: (0, 0)
            if single_buffer_weights:
                # Invariant operands: one VMEM buffer instead of two.
                return pl.BlockSpec(shape, idx, pipeline_mode=pl.Buffered(1))
            return pl.BlockSpec(shape, idx)

        return pl.pallas_call(
            _self_attention_kernel,
            out_shape=jax.ShapeDtypeStruct((nb, block_b, Dp), jnp.float32),
            grid_spec=pltpu.PrefetchScalarGridSpec(
                num_scalar_prefetch=0,
                grid=(nb,),
                in_specs=[
                    pl.BlockSpec((block_b, S, D), lambda b: (b, 0, 0)),  # inp block
                    const_spec((D, 3 * Dp)),                             # fused W (bf16)
                    const_spec((1, 3 * Dp)),                             # fused bias
                    const_spec((1, Dp)),                                 # gamma
                    const_spec((1, Dp)),                                 # beta
                ],
                out_specs=pl.BlockSpec((1, block_b, Dp), lambda b: (b, 0, 0)),
            ),
            compiler_params=pltpu.CompilerParams(
                dimension_semantics=("parallel",),
                vmem_limit_bytes=vmem_limit),
        )(inp, wqkv, bqkv, g2, be2)

    try:
        out = run(single_buffer_weights=True)
    except Exception:
        # Older Pallas without pipeline_mode / Buffered(1): fall back to defaults.
        out = run(single_buffer_weights=False)

    return out.reshape(B, Dp)[:, :D]


def _reference(inp, params):
    """Pure-JAX f32 reference mirroring the PyTorch forward, for a correctness check."""
    B, S, D = inp.shape
    wq, bq, wk, bk, wv, bv, gamma, beta = params
    q = inp @ wq + bq
    k = inp @ wk + bk
    v = inp @ wv + bv
    scores = jnp.einsum("bqd,bkd->bqk", q, k)
    attn = jax.nn.softmax(scores, axis=1) / jnp.sqrt(jnp.float32(D))
    sa = jnp.einsum("bqk,bkd->bqd", attn, v)
    mean = sa.mean(-1, keepdims=True)
    var = ((sa - mean) ** 2).mean(-1, keepdims=True)
    ln = (sa - mean) / jnp.sqrt(var + 1e-5) * gamma + beta
    return ln.sum(axis=1) / S


if __name__ == "__main__":
    B, S, D = 2, 8, 32  # batch, seq_len, dhid (dk = dv = dhid)

    key = jax.random.PRNGKey(0)
    k_inp, k_wq, k_bq, k_wk, k_bk, k_wv, k_bv = jax.random.split(key, 7)

    inp = jax.random.normal(k_inp, (B, S, D), dtype=jnp.float32)
    lens = jnp.full((B,), S, dtype=jnp.int32)  # unused by the module's forward

    # Deterministic synthetic parameters (nn.Linear(dhid, dhid) weights stored
    # as (in, out) so the kernel computes x @ W + b; LayerNorm default affine).
    scale = 1.0 / math.sqrt(D)
    wq = jax.random.uniform(k_wq, (D, D), jnp.float32, -scale, scale)
    bq = jax.random.uniform(k_bq, (D,), jnp.float32, -scale, scale)
    wk = jax.random.uniform(k_wk, (D, D), jnp.float32, -scale, scale)
    bk = jax.random.uniform(k_bk, (D,), jnp.float32, -scale, scale)
    wv = jax.random.uniform(k_wv, (D, D), jnp.float32, -scale, scale)
    bv = jax.random.uniform(k_bv, (D,), jnp.float32, -scale, scale)
    gamma = jnp.ones((D,), jnp.float32)
    beta = jnp.zeros((D,), jnp.float32)
    params = (wq, bq, wk, bk, wv, bv, gamma, beta)

    out = self_attention_transformer_v1(inp, lens, params)
    out = jax.block_until_ready(out)

    ref = _reference(inp, params)
    assert out.shape == (B, D)
    # bf16 MXU inputs + approx reciprocal vs an f32 reference -> relaxed tolerance.
    max_err = float(jnp.max(jnp.abs(out - ref)))
    assert jnp.allclose(out, ref, atol=5e-2, rtol=5e-2), (
        f"mismatch vs reference (max abs err {max_err:.4f})")

    print("KERNEL_OK")
</pallas_src>

<mosaic_0001>
module attributes {stable_mosaic.version = 11 : i64} {
  func.func @_self_attention_kernel(%arg0: i32, %arg1: memref<2x8x32xf32, #tpu.memory_space<vmem>>, %arg2: memref<32x384xbf16, #tpu.memory_space<vmem>>, %arg3: memref<1x384xf32, #tpu.memory_space<vmem>>, %arg4: memref<1x128xf32, #tpu.memory_space<vmem>>, %arg5: memref<1x128xf32, #tpu.memory_space<vmem>>, %arg6: memref<1x2x128xf32, #tpu.memory_space<vmem>>) attributes {dimension_semantics = [#tpu.dimension_semantics<parallel>], iteration_bounds = array<i64: 1>, scalar_prefetch = 0 : i64, scratch_operands = 0 : i64, tpu.core_type = #tpu.core_type<tc>, window_params = [{transform_indices = @transform_0, window_bounds = array<i64: 2, 8, 32>}, {pipeline_mode = #tpu.pipeline_mode<synchronous>, transform_indices = @transform_1, window_bounds = array<i64: 32, 384>}, {pipeline_mode = #tpu.pipeline_mode<synchronous>, transform_indices = @transform_2, window_bounds = array<i64: 1, 384>}, {pipeline_mode = #tpu.pipeline_mode<synchronous>, transform_indices = @transform_3, window_bounds = array<i64: 1, 128>}, {pipeline_mode = #tpu.pipeline_mode<synchronous>, transform_indices = @transform_4, window_bounds = array<i64: 1, 128>}, {transform_indices = @transform_5, window_bounds = array<i64: 1, 2, 128>}]} {
    %c0 = arith.constant 0 : index
    %c0_0 = arith.constant 0 : index
    %c0_1 = arith.constant 0 : index
    %0 = vector.load %arg1[%c0, %c0_0, %c0_1] : memref<2x8x32xf32, #tpu.memory_space<vmem>>, vector<2x8x32xf32>
    %1 = vector.shape_cast %0 : vector<2x8x32xf32> to vector<16x32xf32>
    %2 = arith.truncf %1 : vector<16x32xf32> to vector<16x32xbf16>
    %c0_2 = arith.constant 0 : index
    %c0_3 = arith.constant 0 : index
    %3 = vector.load %arg2[%c0_2, %c0_3] : memref<32x384xbf16, #tpu.memory_space<vmem>>, vector<32x384xbf16>
    %cst = arith.constant dense<0.000000e+00> : vector<16x384xf32>
    %4 = tpu.matmul %2, %3, %cst {dimension_numbers = #tpu.dot_dimension_numbers<[1], [0], [0], [1], [0, 0, 1, 1], [], []>} : vector<16x32xbf16>, vector<32x384xbf16>, vector<16x384xf32> -> vector<16x384xf32>
    %c0_4 = arith.constant 0 : index
    %c0_5 = arith.constant 0 : index
    %5 = vector.load %arg3[%c0_4, %c0_5] : memref<1x384xf32, #tpu.memory_space<vmem>>, vector<1x384xf32>
    %6 = vector.broadcast %5 : vector<1x384xf32> to vector<16x384xf32>
    %7 = arith.addf %4, %6 : vector<16x384xf32>
    %8 = vector.shape_cast %7 : vector<16x384xf32> to vector<2x8x384xf32>
    %9 = vector.extract_strided_slice %8 {offsets = [0, 0, 0], sizes = [2, 8, 128], strides = [1, 1, 1]} : vector<2x8x384xf32> to vector<2x8x128xf32>
    %10 = arith.truncf %9 : vector<2x8x128xf32> to vector<2x8x128xbf16>
    %11 = vector.extract_strided_slice %8 {offsets = [0, 0, 128], sizes = [2, 8, 128], strides = [1, 1, 1]} : vector<2x8x384xf32> to vector<2x8x128xf32>
    %12 = arith.truncf %11 : vector<2x8x128xf32> to vector<2x8x128xbf16>
    %13 = vector.extract_strided_slice %8 {offsets = [0, 0, 256], sizes = [2, 8, 128], strides = [1, 1, 1]} : vector<2x8x384xf32> to vector<2x8x128xf32>
    %14 = arith.truncf %13 : vector<2x8x128xf32> to vector<2x8x128xbf16>
    %cst_6 = arith.constant dense<0.000000e+00> : vector<2x8x8xf32>
    %15 = tpu.matmul %10, %12, %cst_6 {dimension_numbers = #tpu.dot_dimension_numbers<[2], [2], [1], [1], [0, 0, 0, 1, 1, 1], [0], [0]>} : vector<2x8x128xbf16>, vector<2x8x128xbf16>, vector<2x8x8xf32> -> vector<2x8x8xf32>
    %cst_7 = arith.constant dense<0xFF800000> : vector<2x8xf32>
    %16 = vector.multi_reduction <maximumf>, %15, %cst_7 [1] : vector<2x8x8xf32> to vector<2x8xf32>
    %17 = vector.shape_cast %16 : vector<2x8xf32> to vector<2x1x8xf32>
    %18 = vector.broadcast %17 : vector<2x1x8xf32> to vector<2x8x8xf32>
    %19 = arith.subf %15, %18 : vector<2x8x8xf32>
    %20 = math.exp %19 : vector<2x8x8xf32>
    %cst_8 = arith.constant dense<0.000000e+00> : vector<2x8xf32>
    %21 = vector.multi_reduction <add>, %20, %cst_8 [1] : vector<2x8x8xf32> to vector<2x8xf32>
    %22 = vector.shape_cast %21 : vector<2x8xf32> to vector<2x1x8xf32>
    %23 = tpu.reciprocal %22 {approx = true} : vector<2x1x8xf32> -> vector<2x1x8xf32>
    %cst_9 = arith.constant 0.176776692 : f32
    %24 = vector.broadcast %cst_9 : f32 to vector<2x1x8xf32>
    %25 = arith.mulf %23, %24 : vector<2x1x8xf32>
    %26 = vector.broadcast %25 : vector<2x1x8xf32> to vector<2x8x8xf32>
    %27 = arith.mulf %20, %26 : vector<2x8x8xf32>
    %28 = arith.truncf %27 : vector<2x8x8xf32> to vector<2x8x8xbf16>
    %cst_10 = arith.constant dense<0.000000e+00> : vector<2x8x128xf32>
    %29 = tpu.matmul %28, %14, %cst_10 {dimension_numbers = #tpu.dot_dimension_numbers<[2], [1], [1], [2], [0, 0, 0, 1, 1, 2], [0], [0]>} : vector<2x8x8xbf16>, vector<2x8x128xbf16>, vector<2x8x128xf32> -> vector<2x8x128xf32>
    %cst_11 = arith.constant dense<0.000000e+00> : vector<2x8xf32>
    %30 = vector.multi_reduction <add>, %29, %cst_11 [2] : vector<2x8x128xf32> to vector<2x8xf32>
    %31 = vector.shape_cast %30 : vector<2x8xf32> to vector<2x8x1xf32>
    %cst_12 = arith.constant 3.125000e-02 : f32
    %32 = vector.broadcast %cst_12 : f32 to vector<2x8x1xf32>
    %33 = arith.mulf %31, %32 : vector<2x8x1xf32>
    %34 = vector.broadcast %33 : vector<2x8x1xf32> to vector<2x8x128xf32>
    %35 = arith.subf %29, %34 : vector<2x8x128xf32>
    %36 = tpu.iota {dimensions = array<i32: 2>} : vector<1x1x128xi32>
    %c32_i32 = arith.constant 32 : i32
    %37 = vector.broadcast %c32_i32 : i32 to vector<1x1x128xi32>
    %38 = arith.cmpi slt, %36, %37 : vector<1x1x128xi32>
    %39 = arith.extui %38 : vector<1x1x128xi1> to vector<1x1x128xi32>
    %40 = arith.sitofp %39 : vector<1x1x128xi32> to vector<1x1x128xf32>
    %41 = vector.broadcast %40 : vector<1x1x128xf32> to vector<2x8x128xf32>
    %42 = arith.mulf %35, %41 : vector<2x8x128xf32>
    %43 = arith.mulf %42, %42 : vector<2x8x128xf32>
    %cst_13 = arith.constant dense<0.000000e+00> : vector<2x8xf32>
    %44 = vector.multi_reduction <add>, %43, %cst_13 [2] : vector<2x8x128xf32> to vector<2x8xf32>
    %45 = vector.shape_cast %44 : vector<2x8xf32> to vector<2x8x1xf32>
    %cst_14 = arith.constant 3.125000e-02 : f32
    %46 = vector.broadcast %cst_14 : f32 to vector<2x8x1xf32>
    %47 = arith.mulf %45, %46 : vector<2x8x1xf32>
    %cst_15 = arith.constant 9.99999974E-6 : f32
    %48 = vector.broadcast %cst_15 : f32 to vector<2x8x1xf32>
    %49 = arith.addf %47, %48 : vector<2x8x1xf32>
    %50 = math.rsqrt %49 : vector<2x8x1xf32>
    %51 = vector.broadcast %50 : vector<2x8x1xf32> to vector<2x8x128xf32>
    %52 = arith.mulf %42, %51 : vector<2x8x128xf32>
    %c0_16 = arith.constant 0 : index
    %c0_17 = arith.constant 0 : index
    %53 = vector.load %arg4[%c0_16, %c0_17] : memref<1x128xf32, #tpu.memory_space<vmem>>, vector<1x128xf32>
    %54 = vector.shape_cast %53 : vector<1x128xf32> to vector<1x1x128xf32>
    %55 = vector.broadcast %54 : vector<1x1x128xf32> to vector<2x8x128xf32>
    %56 = arith.mulf %52, %55 : vector<2x8x128xf32>
    %c0_18 = arith.constant 0 : index
    %c0_19 = arith.constant 0 : index
    %57 = vector.load %arg5[%c0_18, %c0_19] : memref<1x128xf32, #tpu.memory_space<vmem>>, vector<1x128xf32>
    %58 = vector.shape_cast %57 : vector<1x128xf32> to vector<1x1x128xf32>
    %59 = vector.broadcast %58 : vector<1x1x128xf32> to vector<2x8x128xf32>
    %60 = arith.addf %56, %59 : vector<2x8x128xf32>
    %cst_20 = arith.constant dense<0.000000e+00> : vector<2x128xf32>
    %61 = vector.multi_reduction <add>, %60, %cst_20 [1] : vector<2x8x128xf32> to vector<2x128xf32>
    %cst_21 = arith.constant 1.250000e-01 : f32
    %62 = vector.broadcast %cst_21 : f32 to vector<2x128xf32>
    %63 = arith.mulf %61, %62 : vector<2x128xf32>
    %c0_22 = arith.constant 0 : index
    %c0_23 = arith.constant 0 : index
    %c0_24 = arith.constant 0 : index
    %64 = vector.load %arg6[%c0_22, %c0_23, %c0_24] : memref<1x2x128xf32, #tpu.memory_space<vmem>>, vector<1x2x128xf32>
    %65 = vector.shape_cast %64 : vector<1x2x128xf32> to vector<2x128xf32>
    %66 = vector.shape_cast %63 : vector<2x128xf32> to vector<1x2x128xf32>
    tpu.vector_store %arg6[%c0_22, %c0_23, %c0_24], %66 {strides = array<i32>} : memref<1x2x128xf32, #tpu.memory_space<vmem>>, vector<1x2x128xf32>,
    return
  }
  func.func @transform_0(%arg0: i32) -> (i32, i32, i32) {
    %c0_i32 = arith.constant 0 : i32
    %c0_i32_0 = arith.constant 0 : i32
    %c0_i32_1 = arith.constant 0 : i32
    return %arg0, %c0_i32, %c0_i32_0 : i32, i32, i32
  }
  func.func @transform_1(%arg0: i32) -> (i32, i32) {
    %c0_i32 = arith.constant 0 : i32
    %c0_i32_0 = arith.constant 0 : i32
    %c0_i32_1 = arith.constant 0 : i32
    return %c0_i32, %c0_i32_0 : i32, i32
  }
  func.func @transform_2(%arg0: i32) -> (i32, i32) {
    %c0_i32 = arith.constant 0 : i32
    %c0_i32_0 = arith.constant 0 : i32
    %c0_i32_1 = arith.constant 0 : i32
    return %c0_i32, %c0_i32_0 : i32, i32
  }
  func.func @transform_3(%arg0: i32) -> (i32, i32) {
    %c0_i32 = arith.constant 0 : i32
    %c0_i32_0 = arith.constant 0 : i32
    %c0_i32_1 = arith.constant 0 : i32
    return %c0_i32, %c0_i32_0 : i32, i32
  }
  func.func @transform_4(%arg0: i32) -> (i32, i32) {
    %c0_i32 = arith.constant 0 : i32
    %c0_i32_0 = arith.constant 0 : i32
    %c0_i32_1 = arith.constant 0 : i32
    return %c0_i32, %c0_i32_0 : i32, i32
  }
  func.func @transform_5(%arg0: i32) -> (i32, i32, i32) {
    %c0_i32 = arith.constant 0 : i32
    %c0_i32_0 = arith.constant 0 : i32
    %c0_i32_1 = arith.constant 0 : i32
    return %arg0, %c0_i32, %c0_i32_0 : i32, i32, i32
  }
}

module attributes {stable_mosaic.version = 11 : i64} {
  func.func @_self_attention_kernel(%arg0: i32, %arg1: memref<2x8x32xf32, #tpu.memory_space<vmem>>, %arg2: memref<32x384xbf16, #tpu.memory_space<vmem>>, %arg3: memref<1x384xf32, #tpu.memory_space<vmem>>, %arg4: memref<1x128xf32, #tpu.memory_space<vmem>>, %arg5: memref<1x128xf32, #tpu.memory_space<vmem>>, %arg6: memref<1x2x128xf32, #tpu.memory_space<vmem>>) attributes {dimension_semantics = [#tpu.dimension_semantics<parallel>], iteration_bounds = array<i64: 1>, scalar_prefetch = 0 : i64, scratch_operands = 0 : i64, tpu.core_type = #tpu.core_type<tc>, window_params = [{transform_indices = @transform_0, window_bounds = array<i64: 2, 8, 32>}, {pipeline_mode = #tpu.pipeline_mode<synchronous>, transform_indices = @transform_1, window_bounds = array<i64: 32, 384>}, {pipeline_mode = #tpu.pipeline_mode<synchronous>, transform_indices = @transform_2, window_bounds = array<i64: 1, 384>}, {pipeline_mode = #tpu.pipeline_mode<synchronous>, transform_indices = @transform_3, window_bounds = array<i64: 1, 128>}, {pipeline_mode = #tpu.pipeline_mode<synchronous>, transform_indices = @transform_4, window_bounds = array<i64: 1, 128>}, {transform_indices = @transform_5, window_bounds = array<i64: 1, 2, 128>}]} {
    %c0 = arith.constant 0 : index
    %c0_0 = arith.constant 0 : index
    %c0_1 = arith.constant 0 : index
    %0 = vector.load %arg1[%c0, %c0_0, %c0_1] : memref<2x8x32xf32, #tpu.memory_space<vmem>>, vector<2x8x32xf32>
    %1 = vector.shape_cast %0 : vector<2x8x32xf32> to vector<16x32xf32>
    %2 = arith.truncf %1 : vector<16x32xf32> to vector<16x32xbf16>
    %c0_2 = arith.constant 0 : index
    %c0_3 = arith.constant 0 : index
    %3 = vector.load %arg2[%c0_2, %c0_3] : memref<32x384xbf16, #tpu.memory_space<vmem>>, vector<32x384xbf16>
    %cst = arith.constant dense<0.000000e+00> : vector<16x384xf32>
    %4 = tpu.matmul %2, %3, %cst {dimension_numbers = #tpu.dot_dimension_numbers<[1], [0], [0], [1], [0, 0, 1, 1], [], []>} : vector<16x32xbf16>, vector<32x384xbf16>, vector<16x384xf32> -> vector<16x384xf32>
    %c0_4 = arith.constant 0 : index
    %c0_5 = arith.constant 0 : index
    %5 = vector.load %arg3[%c0_4, %c0_5] : memref<1x384xf32, #tpu.memory_space<vmem>>, vector<1x384xf32>
    %6 = vector.broadcast %5 : vector<1x384xf32> to vector<16x384xf32>
    %7 = arith.addf %4, %6 : vector<16x384xf32>
    %8 = vector.shape_cast %7 : vector<16x384xf32> to vector<2x8x384xf32>
    %9 = vector.extract_strided_slice %8 {offsets = [0, 0, 0], sizes = [2, 8, 128], strides = [1, 1, 1]} : vector<2x8x384xf32> to vector<2x8x128xf32>
    %10 = arith.truncf %9 : vector<2x8x128xf32> to vector<2x8x128xbf16>
    %11 = vector.extract_strided_slice %8 {offsets = [0, 0, 128], sizes = [2, 8, 128], strides = [1, 1, 1]} : vector<2x8x384xf32> to vector<2x8x128xf32>
    %12 = arith.truncf %11 : vector<2x8x128xf32> to vector<2x8x128xbf16>
    %13 = vector.extract_strided_slice %8 {offsets = [0, 0, 256], sizes = [2, 8, 128], strides = [1, 1, 1]} : vector<2x8x384xf32> to vector<2x8x128xf32>
    %14 = arith.truncf %13 : vector<2x8x128xf32> to vector<2x8x128xbf16>
    %cst_6 = arith.constant dense<0.000000e+00> : vector<2x8x8xf32>
    %15 = tpu.matmul %10, %12, %cst_6 {dimension_numbers = #tpu.dot_dimension_numbers<[2], [2], [1], [1], [0, 0, 0, 1, 1, 1], [0], [0]>} : vector<2x8x128xbf16>, vector<2x8x128xbf16>, vector<2x8x8xf32> -> vector<2x8x8xf32>
    %cst_7 = arith.constant dense<0xFF800000> : vector<2x8xf32>
    %16 = vector.multi_reduction <maximumf>, %15, %cst_7 [1] : vector<2x8x8xf32> to vector<2x8xf32>
    %17 = vector.shape_cast %16 : vector<2x8xf32> to vector<2x1x8xf32>
    %18 = vector.broadcast %17 : vector<2x1x8xf32> to vector<2x8x8xf32>
    %19 = arith.subf %15, %18 : vector<2x8x8xf32>
    %20 = math.exp %19 : vector<2x8x8xf32>
    %cst_8 = arith.constant dense<0.000000e+00> : vector<2x8xf32>
    %21 = vector.multi_reduction <add>, %20, %cst_8 [1] : vector<2x8x8xf32> to vector<2x8xf32>
    %22 = vector.shape_cast %21 : vector<2x8xf32> to vector<2x1x8xf32>
    %23 = tpu.reciprocal %22 {approx = true} : vector<2x1x8xf32> -> vector<2x1x8xf32>
    %cst_9 = arith.constant 0.176776692 : f32
    %24 = vector.broadcast %cst_9 : f32 to vector<2x1x8xf32>
    %25 = arith.mulf %23, %24 : vector<2x1x8xf32>
    %26 = vector.broadcast %25 : vector<2x1x8xf32> to vector<2x8x8xf32>
    %27 = arith.mulf %20, %26 : vector<2x8x8xf32>
    %28 = arith.truncf %27 : vector<2x8x8xf32> to vector<2x8x8xbf16>
    %cst_10 = arith.constant dense<0.000000e+00> : vector<2x8x128xf32>
    %29 = tpu.matmul %28, %14, %cst_10 {dimension_numbers = #tpu.dot_dimension_numbers<[2], [1], [1], [2], [0, 0, 0, 1, 1, 2], [0], [0]>} : vector<2x8x8xbf16>, vector<2x8x128xbf16>, vector<2x8x128xf32> -> vector<2x8x128xf32>
    %cst_11 = arith.constant dense<0.000000e+00> : vector<2x8xf32>
    %30 = vector.multi_reduction <add>, %29, %cst_11 [2] : vector<2x8x128xf32> to vector<2x8xf32>
    %31 = vector.shape_cast %30 : vector<2x8xf32> to vector<2x8x1xf32>
    %cst_12 = arith.constant 3.125000e-02 : f32
    %32 = vector.broadcast %cst_12 : f32 to vector<2x8x1xf32>
    %33 = arith.mulf %31, %32 : vector<2x8x1xf32>
    %34 = vector.broadcast %33 : vector<2x8x1xf32> to vector<2x8x128xf32>
    %35 = arith.subf %29, %34 : vector<2x8x128xf32>
    %36 = tpu.iota {dimensions = array<i32: 2>} : vector<1x1x128xi32>
    %c32_i32 = arith.constant 32 : i32
    %37 = vector.broadcast %c32_i32 : i32 to vector<1x1x128xi32>
    %38 = arith.cmpi slt, %36, %37 : vector<1x1x128xi32>
    %39 = arith.extui %38 : vector<1x1x128xi1> to vector<1x1x128xi32>
    %40 = arith.sitofp %39 : vector<1x1x128xi32> to vector<1x1x128xf32>
    %41 = vector.broadcast %40 : vector<1x1x128xf32> to vector<2x8x128xf32>
    %42 = arith.mulf %35, %41 : vector<2x8x128xf32>
    %43 = arith.mulf %42, %42 : vector<2x8x128xf32>
    %cst_13 = arith.constant dense<0.000000e+00> : vector<2x8xf32>
    %44 = vector.multi_reduction <add>, %43, %cst_13 [2] : vector<2x8x128xf32> to vector<2x8xf32>
    %45 = vector.shape_cast %44 : vector<2x8xf32> to vector<2x8x1xf32>
    %cst_14 = arith.constant 3.125000e-02 : f32
    %46 = vector.broadcast %cst_14 : f32 to vector<2x8x1xf32>
    %47 = arith.mulf %45, %46 : vector<2x8x1xf32>
    %cst_15 = arith.constant 9.99999974E-6 : f32
    %48 = vector.broadcast %cst_15 : f32 to vector<2x8x1xf32>
    %49 = arith.addf %47, %48 : vector<2x8x1xf32>
    %50 = math.rsqrt %49 : vector<2x8x1xf32>
    %51 = vector.broadcast %50 : vector<2x8x1xf32> to vector<2x8x128xf32>
    %52 = arith.mulf %42, %51 : vector<2x8x128xf32>
    %c0_16 = arith.constant 0 : index
    %c0_17 = arith.constant 0 : index
    %53 = vector.load %arg4[%c0_16, %c0_17] : memref<1x128xf32, #tpu.memory_space<vmem>>, vector<1x128xf32>
    %54 = vector.shape_cast %53 : vector<1x128xf32> to vector<1x1x128xf32>
    %55 = vector.broadcast %54 : vector<1x1x128xf32> to vector<2x8x128xf32>
    %56 = arith.mulf %52, %55 : vector<2x8x128xf32>
    %c0_18 = arith.constant 0 : index
    %c0_19 = arith.constant 0 : index
    %57 = vector.load %arg5[%c0_18, %c0_19] : memref<1x128xf32, #tpu.memory_space<vmem>>, vector<1x128xf32>
    %58 = vector.shape_cast %57 : vector<1x128xf32> to vector<1x1x128xf32>
    %59 = vector.broadcast %58 : vector<1x1x128xf32> to vector<2x8x128xf32>
    %60 = arith.addf %56, %59 : vector<2x8x128xf32>
    %cst_20 = arith.constant dense<0.000000e+00> : vector<2x128xf32>
    %61 = vector.multi_reduction <add>, %60, %cst_20 [1] : vector<2x8x128xf32> to vector<2x128xf32>
    %cst_21 = arith.constant 1.250000e-01 : f32
    %62 = vector.broadcast %cst_21 : f32 to vector<2x128xf32>
    %63 = arith.mulf %61, %62 : vector<2x128xf32>
    %c0_22 = arith.constant 0 : index
    %c0_23 = arith.constant 0 : index
    %c0_24 = arith.constant 0 : index
    %64 = vector.load %arg6[%c0_22, %c0_23, %c0_24] : memref<1x2x128xf32, #tpu.memory_space<vmem>>, vector<1x2x128xf32>
    %65 = vector.shape_cast %64 : vector<1x2x128xf32> to vector<2x128xf32>
    %66 = vector.shape_cast %63 : vector<2x128xf32> to vector<1x2x128xf32>
    tpu.vector_store %arg6[%c0_22, %c0_23, %c0_24], %66 {strides = array<i32>} : memref<1x2x128xf32, #tpu.memory_space<vmem>>, vector<1x2x128xf32>,
    return
  }
  func.func @transform_0(%arg0: i32) -> (i32, i32, i32) {
    %c0_i32 = arith.constant 0 : i32
    %c0_i32_0 = arith.constant 0 : i32
    %c0_i32_1 = arith.constant 0 : i32
    return %arg0, %c0_i32, %c0_i32_0 : i32, i32, i32
  }
  func.func @transform_1(%arg0: i32) -> (i32, i32) {
    %c0_i32 = arith.constant 0 : i32
    %c0_i32_0 = arith.constant 0 : i32
    %c0_i32_1 = arith.constant 0 : i32
    return %c0_i32, %c0_i32_0 : i32, i32
  }
  func.func @transform_2(%arg0: i32) -> (i32, i32) {
    %c0_i32 = arith.constant 0 : i32
    %c0_i32_0 = arith.constant 0 : i32
    %c0_i32_1 = arith.constant 0 : i32
    return %c0_i32, %c0_i32_0 : i32, i32
  }
  func.func @transform_3(%arg0: i32) -> (i32, i32) {
    %c0_i32 = arith.constant 0 : i32
    %c0_i32_0 = arith.constant 0 : i32
    %c0_i32_1 = arith.constant 0 : i32
    return %c0_i32, %c0_i32_0 : i32, i32
  }
  func.func @transform_4(%arg0: i32) -> (i32, i32) {
    %c0_i32 = arith.constant 0 : i32
    %c0_i32_0 = arith.constant 0 : i32
    %c0_i32_1 = arith.constant 0 : i32
    return %c0_i32, %c0_i32_0 : i32, i32
  }
  func.func @transform_5(%arg0: i32) -> (i32, i32, i32) {
    %c0_i32 = arith.constant 0 : i32
    %c0_i32_0 = arith.constant 0 : i32
    %c0_i32_1 = arith.constant 0 : i32
    return %arg0, %c0_i32, %c0_i32_0 : i32, i32, i32
  }
}

</mosaic_0001>

<bundles_post_ra>
// kernel: tpu_custom_call.1
= control target key start
LH: loop header
LB: loop body
LE: loop exit
PB: predicated region body
PF: predicated region fallthrough
CT: control target
= control target key end

     0   :  { %10 = vsyncpa [#allocation3], 0  ;;  %s738_s0 = inlined_call_operand.hbm [shape: f32[2,8,32], index: 0, kind: input, shape index: {}]   ;;  %s739_s1 = inlined_call_operand.hbm [shape: bf16[32,384], index: 1, kind: input, shape index: {}]   ;;  %s740_s2 = inlined_call_operand.vmem [shape: f32[1,384], index: 2, kind: input, shape index: {}]   ;;  %s741_s3 = inlined_call_operand.vmem [shape: f32[1,128], index: 3, kind: input, shape index: {}]   ;;  %s742_s4 = inlined_call_operand.vmem [shape: f32[1,128], index: 4, kind: input, shape index: {}]   ;;  %s743_s5 = inlined_call_operand.hbm [shape: f32[1,2,128], index: 5, kind: output, shape index: {}]  }
   0x1   :  { %11 = vsyncpa [#allocation6], 0 }
   0x2   :  { %12 = vsyncpa [#allocation4], 0  ;;  %s655_s18 = smov [#allocation2]  }
   0x3   :  { %s18_s19 = sshll.u32 %s655_s18, 4  ;;  %s19_s19 = int_to_ptr.vmem [resolvable:$true] %s18_s19 }
   0x4   :  { %s597_s20 = scalar_lea.vmem %s19_s19, 256  ;;  %p602_p1 = scmp.lt.s32.totalorder %s19_s19, %s19_s19 }
   0x5   :  { %p598_p0 = scmp.ne.s32.totalorder %s19_s19, %s597_s20  ;;  %p603_p2 = scmp.lt.s32.totalorder %s597_s20, %s597_s20 }
   0x7   :  { %p604_p3 = por %p603_p2, %p602_p1 }
   0x9   :  { %p605_p4 = pnand %p604_p3, %p598_p0 }
   0xb   :  { %608 = shalt.err (!%p605_p4)
}
   0xc   :  { %s656_s21 = smov 128   ;;  %s657_s22 = smov 8  }
   0xd   :  { %24 = dma.hbm_to_vmem [thread:$0]  %s738_s0, 256, %s19_s19, [#allocation3], %s656_s21, %s656_s21, %s657_s22  }
   0xe   :  { %s658_s25 = smov [#allocation5]  }
   0xf   :  { %s30_s26 = sshll.u32 %s658_s25, 4  ;;  %s31_s26 = int_to_ptr.vmem [resolvable:$true] %s30_s26 }
  0x10   :  { %s617_s27 = scalar_lea.vmem %s31_s26, 768  ;;  %p622_p6 = scmp.lt.s32.totalorder %s31_s26, %s31_s26 }
  0x11   :  { %p618_p5 = scmp.ne.s32.totalorder %s31_s26, %s617_s27  ;;  %p623_p7 = scmp.lt.s32.totalorder %s617_s27, %s617_s27 }
  0x13   :  { %p624_p8 = por %p623_p7, %p622_p6 }
  0x15   :  { %p625_p9 = pnand %p624_p8, %p618_p5 }
  0x17   :  { %628 = shalt.err (!%p625_p9)
}
  0x18   :  { %s659_s28 = smov 192   ;;  %s660_s29 = smov 12  }
  0x19   :  { %36 = dma.hbm_to_vmem [thread:$0]  %s739_s1, 768, %s31_s26, [#allocation6], %s659_s28, %s659_s28, %s660_s29  }
  0x1a   :  { %649 = dma.done.wait [#allocation3], 256  }
  0x1b   :  { %650 = vsyncadd [#allocation3], 4294967040 }
  0x1c   :  { %651 = dma.done.wait [#allocation6], 768  }
  0x1d   :  { %652 = vsyncadd [#allocation6], 4294966528  ;;  %v661_v0 = vmov 0   ;;  %v662_v1 = vmov 0.0   ;;  %v569_v2 = vld [vmem:[#allocation5 + $0x1c] ss:$12 sps:$4 sm:$0xff]   ;;  %v63_v11 = vlaneseq }
  0x1e   :  { %146 = vmatprep.mubr.bf16.mxu0 %v661_v0  ;;  %527 = vmatprep.subr.bf16.mxu1 %v662_v1  ;;  %v571_v3 = vld [vmem:[#allocation5 + $0x18] ss:$12 sps:$4 sm:$0xff]   ;;  %v574_v5 = vld [vmem:[#allocation5] ss:$12 sps:$4 sm:$0xff]   ;;  %v50_v6 = vld [vmem:[#allocation2] sm:$0xff]  ;;  %vm110_vm0 = vcmask 261120  }
  0x1f   :  { %126 = vmatprep.subr.bf16.mxu0 %v569_v2  ;;  %v572_v4 = vld [vmem:[#allocation5 + $0x4] ss:$12 sps:$4 sm:$0xff]   ;;  %v51_v7 = vld [vmem:[#allocation2 + $0x8] sm:$0xff]  ;;  %v575_v8 = vld [vmem:[#allocation5 + $0x20] ss:$12 sps:$4 sm:$0xff]   ;;  %vm663_vm1 = vmmov 0  }
  0x20   :  { %127 = vmatpush1.bf16.msra.mxu0 %v571_v3  ;;  %v52_v9 = vpack.c.bf16 %v51_v7, %v50_v6  ;;  %528 = vmatpush3.bf16.msra.mxu1 %v575_v8  ;;  %v576_v10 = vld [vmem:[#allocation5 + $0x8] ss:$12 sps:$4 sm:$0xff]   ;;  %v64_v12 = vshrl.u32 %v63_v11, 7  ;;  %v61_v14 = vld [vmem:[%s740_s2] sm:$0x7]  ;;  %vm330_vm2 = vcmask 1043456  }
  0x21   :  { %128 = vmatprep.subr.bf16.mxu0 %v572_v4  ;;  %529 = vmatprep.subr.bf16.mxu1 %v662_v1  ;;  %vm284_vm3 = vcmask 64512   ;;  %vm483_vm5 = vcmask 1041409  }
  0x22   :  { %531 = vmatprep.mubr.msk.bf16.mxu1 %vm663_vm1, %v662_v1  ;;  %v69_v13 = vsub.s32 1, %v64_v12  ;;  %v65_v16 = vsub.s32 0, %v64_v12  ;;  %v73_v30 = vsub.s32 2, %v64_v12 }
  0x24   :  { %129 = vmatpush1.bf16.msra.mxu0 %v574_v5  ;;  %530 = vmatpush3.bf16.msra.mxu1 %v576_v10  ;;  %v70_v15 = vrot.slane %v61_v14, %v69_v13  ;;  %v66_v20 = vrot.slane %v61_v14, %v65_v16  ;;  %v74_v31 = vrot.slane %v61_v14, %v73_v30 }
  0x25   :  { %535 = vmatprep.subr.bf16.mxu0 %v662_v1  ;;  %541 = vmatprep.subr.bf16.mxu1 %v662_v1 }
  0x27   :  { %509 = vmatmul.mubr.msk.bf16.vlgmr.msra.gmra.mxu0 %vm110_vm0, %v52_v9  ;;  %532 = vmatmul.mubr.msk.bf16.vlgmr.msra.gmra.mxu1 %vm110_vm0, %v52_v9 }
  0x28   :  { %537 = vmatprep.mubr.msk.bf16.mxu0 %vm663_vm1, %v662_v1  ;;  %543 = vmatprep.mubr.msk.bf16.mxu1 %vm663_vm1, %v662_v1 }
  0xe7   :  { %v148_v17 = vpop.f32.mrf.mxu0  ;;  %v191_v32 = vpop.f32.mrf.mxu1 }
  0xe8   :  { %v149_v25 = vadd.f32 %v148_v17, %v66_v20  ;;  %v192_v33 = vadd.f32 %v191_v32, %v74_v31 }
  0xe9   :  { %v150_v18 = vpop.f32.mrf.mxu0  ;;  %v533_v34 = vpop.f32.mrf.mxu1 }
  0xea   :  { %v151_v19 = vadd.f32 %v150_v18, %v70_v15  ;;  %v198_v27 = vpack.c.bf16 %v149_v25, %v149_v25  ;;  %v202_v35 = vpack.c.bf16 %v192_v33, %v192_v33 }
  0xeb   :  { %v152_v21 = vpop.f32.mrf.mxu0  ;;  %v194_v36 = vpop.f32.mrf.mxu1 }
  0xec   :  { %v200_v22 = vpack.c.bf16 %v151_v19, %v151_v19  ;;  %v153_v28 = vadd.f32 %v152_v21, %v66_v20  ;;  %v332_v37 = vsel %vm330_vm2, %v202_v35, 0  ;;  %v195_v38 = vadd.f32 %v194_v36, %v74_v31 }
  0xed   :  { %v154_v23 = vpop.f32.mrf.mxu0  ;;  %v534_v39 = vpop.f32.mrf.mxu1 }
  0xee   :  { %v155_v24 = vadd.f32 %v154_v23, %v70_v15  ;;  %536 = vmatpush3.bf16.xpose.msra.mxu0 %v200_v22  ;;  %v199_v29 = vpack.c.bf16 %v153_v28, %v153_v28  ;;  %v203_v40 = vpack.c.bf16 %v195_v38, %v195_v38  ;;  %v429_v38 = vand.u32 127, %v63_v11 }
  0xef   :  { %547 = vmatprep.subr.bf16.mxu0 %v662_v1 }
  0xf0   :  { %v201_v26 = vpack.c.bf16 %v155_v24, %v155_v24  ;;  %v378_v41 = vsel %vm330_vm2, %v203_v40, 0  ;;  %vm430_vm4 = vcmp.lt.s32.totalorder %v429_v38, 32 }
  0xf2   :  { %542 = vmatpush3.bf16.xpose.msra.mxu1 %v201_v26 }
  0xf3   :  { %553 = vmatprep.subr.bf16.mxu1 %v662_v1 }
  0xf5   :  { %538 = vmatmul.mubr.bf16.vlgmr.msra.gmra.mxu0 %v198_v27 }
  0xf6   :  { %549 = vmatprep.mubr.msk.bf16.mxu0 %vm663_vm1, %v662_v1  ;;  %548 = vmatpush3.bf16.msra.mxu0 %v332_v37 }
  0xf9   :  { %544 = vmatmul.mubr.bf16.vlgmr.msra.gmra.mxu1 %v199_v29 }
  0xfa   :  { %555 = vmatprep.mubr.msk.bf16.mxu1 %vm663_vm1, %v662_v1  ;;  %554 = vmatpush3.bf16.msra.mxu1 %v378_v41  ;;  %v513_v41 = vsel %vm430_vm4, 1.0, %v662_v1  ;;  %v514_v1 = vld [vmem:[%s741_s3] ss:$0 sm:$0xff]  ;;  %s664_s3 = smov [#allocation7]  }
 0x1b5   :  { %v238_v42 = vpop.f32.mrf.mxu0 }
 0x1b6   :  { %v285_v43 = vsel %vm284_vm3, %v238_v42, -inf }
 0x1b7   :  { %v286_v44 = vrot.slane %v285_v43, 4  ;;  %v539_v45 = vpop.f32.mrf.mxu0 }
 0x1b9   :  { %v287_v46 = vmax.f32 %v285_v43, %v286_v44  ;;  %v241_v47 = vpop.f32.mrf.mxu0  ;;  %v278_v48 = vpop.f32.mrf.mxu1 }
 0x1ba   :  { %v292_v49 = vsel %vm284_vm3, %v278_v48, -inf }
 0x1bb   :  { %v288_v50 = vrot.slane %v287_v46, 2  ;;  %v293_v51 = vrot.slane %v292_v49, 4  ;;  %v540_v52 = vpop.f32.mrf.mxu0  ;;  %v545_v53 = vpop.f32.mrf.mxu1 }
 0x1bd   :  { %v289_v54 = vmax.f32 %v287_v46, %v288_v50  ;;  %v294_v55 = vmax.f32 %v292_v49, %v293_v51  ;;  %v281_v56 = vpop.f32.mrf.mxu1 }
 0x1bf   :  { %v290_v57 = vrot.slane %v289_v54, 1  ;;  %v295_v58 = vrot.slane %v294_v55, 2  ;;  %v546_v59 = vpop.f32.mrf.mxu1 }
 0x1c1   :  { %v291_v60 = vmax.f32 %v289_v54, %v290_v57  ;;  %v296_v61 = vmax.f32 %v294_v55, %v295_v58  ;;  %v515_v57 = vld [vmem:[%s742_s4] ss:$0 sm:$0xff]  ;;  %s493_s4 = sshll.u32 %s664_s3, 4  ;;  %s494_s4 = int_to_ptr.vmem [resolvable:$true] %s493_s4 }
 0x1c2   :  { %s629_s10 = scalar_lea.vmem %s494_s4, 32  ;;  %p634_p11 = scmp.lt.s32.totalorder %s494_s4, %s494_s4 }
 0x1c3   :  { %v299_v62 = vsub.f32 %v238_v42, %v291_v60  ;;  %v297_v63 = vrot.slane %v296_v61, 1  ;;  %p630_p10 = scmp.ne.s32.totalorder %s494_s4, %s629_s10  ;;  %p635_p12 = scmp.lt.s32.totalorder %s629_s10, %s629_s10 }
 0x1c5   :  { %v301_v0 = vmul.f32 1.442695, %v299_v62  ;;  %v298_v2 = vmax.f32 %v296_v61, %v297_v63  ;;  %p636_p13 = por %p635_p12, %p634_p11 }
 0x1c7   :  { %577 = vpow2.f32 %v301_v0  ;;  %v300_v3 = vsub.f32 %v278_v48, %v298_v2  ;;  %p637_p0 = pnand %p636_p13, %p630_p10 }
 0x1c9   :  { %v303_v4 = vmul.f32 1.442695, %v300_v3 }
 0x1cb   :  { %579 = vpow2.f32 %v303_v4 }
 0x1d4   :  { %v578_v5 = vpop.eup %577 }
 0x1d5   :  { %v305_v6 = vsel %vm284_vm3, %v578_v5, 0.0 }
 0x1d6   :  { %v306_v7 = vrot.slane %v305_v6, 4 }
 0x1d8   :  { %v580_v8 = vpop.eup %579  ;;  %v307_v9 = vadd.f32 %v306_v7, %v305_v6 }
 0x1d9   :  { %v312_v10 = vsel %vm284_vm3, %v580_v8, 0.0 }
 0x1da   :  { %v308_v12 = vrot.slane %v307_v9, 2  ;;  %v313_v13 = vrot.slane %v312_v10, 4 }
 0x1dc   :  { %v309_v14 = vadd.f32 %v308_v12, %v307_v9  ;;  %v314_v15 = vadd.f32 %v313_v13, %v312_v10 }
 0x1de   :  { %v315_v16 = vrot.slane %v314_v15, 2  ;;  %v310_v17 = vrot.slane %v309_v14, 1 }
 0x1e0   :  { %v316_v18 = vadd.f32 %v315_v16, %v314_v15  ;;  %v311_v19 = vadd.f32 %v310_v17, %v309_v14 }
 0x1e2   :  { %581 = vrcp.f32 %v311_v19  ;;  %v317_v20 = vrot.slane %v316_v18, 1 }
 0x1e4   :  { %v318_v21 = vadd.f32 %v317_v20, %v316_v18 }
 0x1e6   :  { %583 = vrcp.f32 %v318_v21 }
 0x1ef   :  { %v582_v22 = vpop.eup %581 }
 0x1f0   :  { %v321_v23 = vmul.f32 0.17677669, %v582_v22 }
 0x1f2   :  { %v323_v24 = vmul.f32 %v578_v5, %v321_v23 }
 0x1f3   :  { %v584_v25 = vpop.eup %583 }
 0x1f4   :  { %v325_v26 = vpack.c.bf16 %v323_v24, %v323_v24  ;;  %v322_v27 = vmul.f32 0.17677669, %v584_v25 }
 0x1f6   :  { %550 = vmatmul.mubr.msk.bf16.vlgmr.msra.gmra.mxu0 %vm284_vm3, %v325_v26  ;;  %v324_v28 = vmul.f32 %v580_v8, %v322_v27 }
 0x1f8   :  { %v326_v29 = vpack.c.bf16 %v324_v28, %v324_v28 }
 0x1fa   :  { %556 = vmatmul.mubr.msk.bf16.vlgmr.msra.gmra.mxu1 %vm284_vm3, %v326_v29 }
 0x2b6   :  { %v368_v30 = vpop.f32.mrf.mxu0 }
 0x2b7   :  { %420 = vadd.xlane.f32.xlu0 %v368_v30 }
 0x2b8   :  { %v551_v31 = vpop.f32.mrf.mxu0 }
 0x2ba   :  { %v371_v32 = vpop.f32.mrf.mxu0  ;;  %v414_v33 = vpop.f32.mrf.mxu1 }
 0x2bb   :  { %422 = vadd.xlane.f32.xlu0 %v414_v33 }
 0x2bc   :  { %v552_v34 = vpop.f32.mrf.mxu0  ;;  %v557_v35 = vpop.f32.mrf.mxu1 }
 0x2be   :  { %v417_v36 = vpop.f32.mrf.mxu1 }
 0x2c0   :  { %v558_v37 = vpop.f32.mrf.mxu1 }
 0x340   :  { %v421_v39 = vpop.xlane.xlu0 %420 }
 0x341   :  { %v424_v40 = vmul.f32 0.03125, %v421_v39 }
 0x343   :  { %v426_v42 = vsub.f32 %v368_v30, %v424_v40 }
 0x344   :  { %v423_v43 = vpop.xlane.xlu0 %422 }
 0x345   :  { %v425_v44 = vmul.f32 0.03125, %v423_v43  ;;  %v433_v45 = vmul.f32 %v513_v41, %v426_v42 }
 0x347   :  { %v427_v46 = vsub.f32 %v414_v33, %v425_v44  ;;  %v435_v47 = vmul.f32 %v433_v45, %v433_v45 }
 0x349   :  { %437 = vadd.xlane.f32.xlu1 %v435_v47  ;;  %v434_v48 = vmul.f32 %v513_v41, %v427_v46 }
 0x34b   :  { %v436_v49 = vmul.f32 %v434_v48, %v434_v48 }
 0x34d   :  { %439 = vadd.xlane.f32.xlu1 %v436_v49 }
 0x3d2   :  { %v438_v50 = vpop.xlane.xlu1 %437 }
 0x3d3   :  { %v441_v51 = vmul.f32 0.03125, %v438_v50 }
 0x3d5   :  { %v443_v52 = vadd.f32 1e-05, %v441_v51 }
 0x3d6   :  { %v440_v53 = vpop.xlane.xlu1 %439 }
 0x3d7   :  { %585 = vrsqrt.f32 %v443_v52  ;;  %v442_v11 = vmul.f32 0.03125, %v440_v53 }
 0x3d9   :  { %v444_v54 = vadd.f32 1e-05, %v442_v11 }
 0x3db   :  { %587 = vrsqrt.f32 %v444_v54 }
 0x3e4   :  { %v586_v55 = vpop.eup %585 }
 0x3e5   :  { %v447_v56 = vmul.f32 %v586_v55, %v433_v45 }
 0x3e7   :  { %v456_v58 = vmul.f32 %v514_v1, %v447_v56 }
 0x3e8   :  { %v588_v59 = vpop.eup %587 }
 0x3e9   :  { %v448_v60 = vmul.f32 %v588_v59, %v434_v48  ;;  %v465_v61 = vadd.f32 %v515_v57, %v456_v58 }
 0x3eb   :  { %v457_v62 = vmul.f32 %v514_v1, %v448_v60  ;;  %v467_v63 = vrot.slane %v465_v61, 4 }
 0x3ed   :  { %v466_v0 = vadd.f32 %v515_v57, %v457_v62  ;;  %v468_v2 = vadd.f32 %v467_v63, %v465_v61 }
 0x3ef   :  { %v469_v3 = vrot.slane %v468_v2, 2  ;;  %v473_v4 = vrot.slane %v466_v0, 4 }
 0x3f1   :  { %v470_v5 = vadd.f32 %v469_v3, %v468_v2  ;;  %v474_v6 = vadd.f32 %v473_v4, %v466_v0 }
 0x3f3   :  { %v471_v7 = vrot.slane %v470_v5, 1  ;;  %v475_v8 = vrot.slane %v474_v6, 2 }
 0x3f5   :  { %v476_v9 = vadd.f32 %v475_v8, %v474_v6  ;;  %v472_v10 = vadd.f32 %v471_v7, %v470_v5 }
 0x3f7   :  { %v477_v12 = vrot.slane %v476_v9, 1  ;;  %v479_v14 = vmul.f32 0.125, %v472_v10 }
 0x3f9   :  { %v478_v13 = vadd.f32 %v477_v12, %v476_v9 }
 0x3fb   :  { %v480_v15 = vmul.f32 0.125, %v478_v13 }
 0x3fd   :  { %v484_v16 = vsel %vm483_vm5, %v480_v15, %v479_v14 }
 0x3fe   :  { %486 = vst [vmem:[#allocation7] sm:$0x3] %v484_v16 }
 0x3ff   :  { %640 = shalt.err (!%p637_p0)
}
 0x400   :  { %496 = dma.vmem_to_hbm [thread:$0]  %s494_s4, 32, %s743_s5, [#allocation4]  }
 0x401   :  { %653 = dma.done.wait [#allocation4], 32  }
 0x402   :  { %654 = vsyncadd [#allocation4], 4294967264 }
 0x403   :  { %500 = vsyncpa [#allocation3], 1 }
 0x404   :  { %501 = vsyncpa [#allocation6], 1 }
 0x405   :  { %502 = vsyncpa [#allocation4], 1 }

// kernel: tpu_custom_call.1
= control target key start
LH: loop header
LB: loop body
LE: loop exit
PB: predicated region body
PF: predicated region fallthrough
CT: control target
= control target key end

     0   :  { %10 = vsyncpa [#allocation3], 0  ;;  %s738_s0 = inlined_call_operand.hbm [shape: f32[2,8,32], index: 0, kind: input, shape index: {}]   ;;  %s739_s1 = inlined_call_operand.hbm [shape: bf16[32,384], index: 1, kind: input, shape index: {}]   ;;  %s740_s2 = inlined_call_operand.vmem [shape: f32[1,384], index: 2, kind: input, shape index: {}]   ;;  %s741_s3 = inlined_call_operand.vmem [shape: f32[1,128], index: 3, kind: input, shape index: {}]   ;;  %s742_s4 = inlined_call_operand.vmem [shape: f32[1,128], index: 4, kind: input, shape index: {}]   ;;  %s743_s5 = inlined_call_operand.hbm [shape: f32[1,2,128], index: 5, kind: output, shape index: {}]  }
   0x1   :  { %11 = vsyncpa [#allocation6], 0 }
   0x2   :  { %12 = vsyncpa [#allocation4], 0  ;;  %s655_s18 = smov [#allocation2]  }
   0x3   :  { %s18_s19 = sshll.u32 %s655_s18, 4  ;;  %s19_s19 = int_to_ptr.vmem [resolvable:$true] %s18_s19 }
   0x4   :  { %s597_s20 = scalar_lea.vmem %s19_s19, 256  ;;  %p602_p1 = scmp.lt.s32.totalorder %s19_s19, %s19_s19 }
   0x5   :  { %p598_p0 = scmp.ne.s32.totalorder %s19_s19, %s597_s20  ;;  %p603_p2 = scmp.lt.s32.totalorder %s597_s20, %s597_s20 }
   0x7   :  { %p604_p3 = por %p603_p2, %p602_p1 }
   0x9   :  { %p605_p4 = pnand %p604_p3, %p598_p0 }
   0xb   :  { %608 = shalt.err (!%p605_p4)
}
   0xc   :  { %s656_s21 = smov 128   ;;  %s657_s22 = smov 8  }
   0xd   :  { %24 = dma.hbm_to_vmem [thread:$0]  %s738_s0, 256, %s19_s19, [#allocation3], %s656_s21, %s656_s21, %s657_s22  }
   0xe   :  { %s658_s25 = smov [#allocation5]  }
   0xf   :  { %s30_s26 = sshll.u32 %s658_s25, 4  ;;  %s31_s26 = int_to_ptr.vmem [resolvable:$true] %s30_s26 }
  0x10   :  { %s617_s27 = scalar_lea.vmem %s31_s26, 768  ;;  %p622_p6 = scmp.lt.s32.totalorder %s31_s26, %s31_s26 }
  0x11   :  { %p618_p5 = scmp.ne.s32.totalorder %s31_s26, %s617_s27  ;;  %p623_p7 = scmp.lt.s32.totalorder %s617_s27, %s617_s27 }
  0x13   :  { %p624_p8 = por %p623_p7, %p622_p6 }
  0x15   :  { %p625_p9 = pnand %p624_p8, %p618_p5 }
  0x17   :  { %628 = shalt.err (!%p625_p9)
}
  0x18   :  { %s659_s28 = smov 192   ;;  %s660_s29 = smov 12  }
  0x19   :  { %36 = dma.hbm_to_vmem [thread:$0]  %s739_s1, 768, %s31_s26, [#allocation6], %s659_s28, %s659_s28, %s660_s29  }
  0x1a   :  { %649 = dma.done.wait [#allocation3], 256  }
  0x1b   :  { %650 = vsyncadd [#allocation3], 4294967040 }
  0x1c   :  { %651 = dma.done.wait [#allocation6], 768  }
  0x1d   :  { %652 = vsyncadd [#allocation6], 4294966528  ;;  %v661_v0 = vmov 0   ;;  %v662_v1 = vmov 0.0   ;;  %v569_v2 = vld [vmem:[#allocation5 + $0x1c] ss:$12 sps:$4 sm:$0xff]   ;;  %v63_v11 = vlaneseq }
  0x1e   :  { %146 = vmatprep.mubr.bf16.mxu0 %v661_v0  ;;  %527 = vmatprep.subr.bf16.mxu1 %v662_v1  ;;  %v571_v3 = vld [vmem:[#allocation5 + $0x18] ss:$12 sps:$4 sm:$0xff]   ;;  %v574_v5 = vld [vmem:[#allocation5] ss:$12 sps:$4 sm:$0xff]   ;;  %v50_v6 = vld [vmem:[#allocation2] sm:$0xff]  ;;  %vm110_vm0 = vcmask 261120  }
  0x1f   :  { %126 = vmatprep.subr.bf16.mxu0 %v569_v2  ;;  %v572_v4 = vld [vmem:[#allocation5 + $0x4] ss:$12 sps:$4 sm:$0xff]   ;;  %v51_v7 = vld [vmem:[#allocation2 + $0x8] sm:$0xff]  ;;  %v575_v8 = vld [vmem:[#allocation5 + $0x20] ss:$12 sps:$4 sm:$0xff]   ;;  %vm663_vm1 = vmmov 0  }
  0x20   :  { %127 = vmatpush1.bf16.msra.mxu0 %v571_v3  ;;  %v52_v9 = vpack.c.bf16 %v51_v7, %v50_v6  ;;  %528 = vmatpush3.bf16.msra.mxu1 %v575_v8  ;;  %v576_v10 = vld [vmem:[#allocation5 + $0x8] ss:$12 sps:$4 sm:$0xff]   ;;  %v64_v12 = vshrl.u32 %v63_v11, 7  ;;  %v61_v14 = vld [vmem:[%s740_s2] sm:$0x7]  ;;  %vm330_vm2 = vcmask 1043456  }
  0x21   :  { %128 = vmatprep.subr.bf16.mxu0 %v572_v4  ;;  %529 = vmatprep.subr.bf16.mxu1 %v662_v1  ;;  %vm284_vm3 = vcmask 64512   ;;  %vm483_vm5 = vcmask 1041409  }
  0x22   :  { %531 = vmatprep.mubr.msk.bf16.mxu1 %vm663_vm1, %v662_v1  ;;  %v69_v13 = vsub.s32 1, %v64_v12  ;;  %v65_v16 = vsub.s32 0, %v64_v12  ;;  %v73_v30 = vsub.s32 2, %v64_v12 }
  0x24   :  { %129 = vmatpush1.bf16.msra.mxu0 %v574_v5  ;;  %530 = vmatpush3.bf16.msra.mxu1 %v576_v10  ;;  %v70_v15 = vrot.slane %v61_v14, %v69_v13  ;;  %v66_v20 = vrot.slane %v61_v14, %v65_v16  ;;  %v74_v31 = vrot.slane %v61_v14, %v73_v30 }
  0x25   :  { %535 = vmatprep.subr.bf16.mxu0 %v662_v1  ;;  %541 = vmatprep.subr.bf16.mxu1 %v662_v1 }
  0x27   :  { %509 = vmatmul.mubr.msk.bf16.vlgmr.msra.gmra.mxu0 %vm110_vm0, %v52_v9  ;;  %532 = vmatmul.mubr.msk.bf16.vlgmr.msra.gmra.mxu1 %vm110_vm0, %v52_v9 }
  0x28   :  { %537 = vmatprep.mubr.msk.bf16.mxu0 %vm663_vm1, %v662_v1  ;;  %543 = vmatprep.mubr.msk.bf16.mxu1 %vm663_vm1, %v662_v1 }
  0xe7   :  { %v148_v17 = vpop.f32.mrf.mxu0  ;;  %v191_v32 = vpop.f32.mrf.mxu1 }
  0xe8   :  { %v149_v25 = vadd.f32 %v148_v17, %v66_v20  ;;  %v192_v33 = vadd.f32 %v191_v32, %v74_v31 }
  0xe9   :  { %v150_v18 = vpop.f32.mrf.mxu0  ;;  %v533_v34 = vpop.f32.mrf.mxu1 }
  0xea   :  { %v151_v19 = vadd.f32 %v150_v18, %v70_v15  ;;  %v198_v27 = vpack.c.bf16 %v149_v25, %v149_v25  ;;  %v202_v35 = vpack.c.bf16 %v192_v33, %v192_v33 }
  0xeb   :  { %v152_v21 = vpop.f32.mrf.mxu0  ;;  %v194_v36 = vpop.f32.mrf.mxu1 }
  0xec   :  { %v200_v22 = vpack.c.bf16 %v151_v19, %v151_v19  ;;  %v153_v28 = vadd.f32 %v152_v21, %v66_v20  ;;  %v332_v37 = vsel %vm330_vm2, %v202_v35, 0  ;;  %v195_v38 = vadd.f32 %v194_v36, %v74_v31 }
  0xed   :  { %v154_v23 = vpop.f32.mrf.mxu0  ;;  %v534_v39 = vpop.f32.mrf.mxu1 }
  0xee   :  { %v155_v24 = vadd.f32 %v154_v23, %v70_v15  ;;  %536 = vmatpush3.bf16.xpose.msra.mxu0 %v200_v22  ;;  %v199_v29 = vpack.c.bf16 %v153_v28, %v153_v28  ;;  %v203_v40 = vpack.c.bf16 %v195_v38, %v195_v38  ;;  %v429_v38 = vand.u32 127, %v63_v11 }
  0xef   :  { %547 = vmatprep.subr.bf16.mxu0 %v662_v1 }
  0xf0   :  { %v201_v26 = vpack.c.bf16 %v155_v24, %v155_v24  ;;  %v378_v41 = vsel %vm330_vm2, %v203_v40, 0  ;;  %vm430_vm4 = vcmp.lt.s32.totalorder %v429_v38, 32 }
  0xf2   :  { %542 = vmatpush3.bf16.xpose.msra.mxu1 %v201_v26 }
  0xf3   :  { %553 = vmatprep.subr.bf16.mxu1 %v662_v1 }
  0xf5   :  { %538 = vmatmul.mubr.bf16.vlgmr.msra.gmra.mxu0 %v198_v27 }
  0xf6   :  { %549 = vmatprep.mubr.msk.bf16.mxu0 %vm663_vm1, %v662_v1  ;;  %548 = vmatpush3.bf16.msra.mxu0 %v332_v37 }
  0xf9   :  { %544 = vmatmul.mubr.bf16.vlgmr.msra.gmra.mxu1 %v199_v29 }
  0xfa   :  { %555 = vmatprep.mubr.msk.bf16.mxu1 %vm663_vm1, %v662_v1  ;;  %554 = vmatpush3.bf16.msra.mxu1 %v378_v41  ;;  %v513_v41 = vsel %vm430_vm4, 1.0, %v662_v1  ;;  %v514_v1 = vld [vmem:[%s741_s3] ss:$0 sm:$0xff]  ;;  %s664_s3 = smov [#allocation7]  }
 0x1b5   :  { %v238_v42 = vpop.f32.mrf.mxu0 }
 0x1b6   :  { %v285_v43 = vsel %vm284_vm3, %v238_v42, -inf }
 0x1b7   :  { %v286_v44 = vrot.slane %v285_v43, 4  ;;  %v539_v45 = vpop.f32.mrf.mxu0 }
 0x1b9   :  { %v287_v46 = vmax.f32 %v285_v43, %v286_v44  ;;  %v241_v47 = vpop.f32.mrf.mxu0  ;;  %v278_v48 = vpop.f32.mrf.mxu1 }
 0x1ba   :  { %v292_v49 = vsel %vm284_vm3, %v278_v48, -inf }
 0x1bb   :  { %v288_v50 = vrot.slane %v287_v46, 2  ;;  %v293_v51 = vrot.slane %v292_v49, 4  ;;  %v540_v52 = vpop.f32.mrf.mxu0  ;;  %v545_v53 = vpop.f32.mrf.mxu1 }
 0x1bd   :  { %v289_v54 = vmax.f32 %v287_v46, %v288_v50  ;;  %v294_v55 = vmax.f32 %v292_v49, %v293_v51  ;;  %v281_v56 = vpop.f32.mrf.mxu1 }
 0x1bf   :  { %v290_v57 = vrot.slane %v289_v54, 1  ;;  %v295_v58 = vrot.slane %v294_v55, 2  ;;  %v546_v59 = vpop.f32.mrf.mxu1 }
 0x1c1   :  { %v291_v60 = vmax.f32 %v289_v54, %v290_v57  ;;  %v296_v61 = vmax.f32 %v294_v55, %v295_v58  ;;  %v515_v57 = vld [vmem:[%s742_s4] ss:$0 sm:$0xff]  ;;  %s493_s4 = sshll.u32 %s664_s3, 4  ;;  %s494_s4 = int_to_ptr.vmem [resolvable:$true] %s493_s4 }
 0x1c2   :  { %s629_s10 = scalar_lea.vmem %s494_s4, 32  ;;  %p634_p11 = scmp.lt.s32.totalorder %s494_s4, %s494_s4 }
 0x1c3   :  { %v299_v62 = vsub.f32 %v238_v42, %v291_v60  ;;  %v297_v63 = vrot.slane %v296_v61, 1  ;;  %p630_p10 = scmp.ne.s32.totalorder %s494_s4, %s629_s10  ;;  %p635_p12 = scmp.lt.s32.totalorder %s629_s10, %s629_s10 }
 0x1c5   :  { %v301_v0 = vmul.f32 1.442695, %v299_v62  ;;  %v298_v2 = vmax.f32 %v296_v61, %v297_v63  ;;  %p636_p13 = por %p635_p12, %p634_p11 }
 0x1c7   :  { %577 = vpow2.f32 %v301_v0  ;;  %v300_v3 = vsub.f32 %v278_v48, %v298_v2  ;;  %p637_p0 = pnand %p636_p13, %p630_p10 }
 0x1c9   :  { %v303_v4 = vmul.f32 1.442695, %v300_v3 }
 0x1cb   :  { %579 = vpow2.f32 %v303_v4 }
 0x1d4   :  { %v578_v5 = vpop.eup %577 }
 0x1d5   :  { %v305_v6 = vsel %vm284_vm3, %v578_v5, 0.0 }
 0x1d6   :  { %v306_v7 = vrot.slane %v305_v6, 4 }
 0x1d8   :  { %v580_v8 = vpop.eup %579  ;;  %v307_v9 = vadd.f32 %v306_v7, %v305_v6 }
 0x1d9   :  { %v312_v10 = vsel %vm284_vm3, %v580_v8, 0.0 }
 0x1da   :  { %v308_v12 = vrot.slane %v307_v9, 2  ;;  %v313_v13 = vrot.slane %v312_v10, 4 }
 0x1dc   :  { %v309_v14 = vadd.f32 %v308_v12, %v307_v9  ;;  %v314_v15 = vadd.f32 %v313_v13, %v312_v10 }
 0x1de   :  { %v315_v16 = vrot.slane %v314_v15, 2  ;;  %v310_v17 = vrot.slane %v309_v14, 1 }
 0x1e0   :  { %v316_v18 = vadd.f32 %v315_v16, %v314_v15  ;;  %v311_v19 = vadd.f32 %v310_v17, %v309_v14 }
 0x1e2   :  { %581 = vrcp.f32 %v311_v19  ;;  %v317_v20 = vrot.slane %v316_v18, 1 }
 0x1e4   :  { %v318_v21 = vadd.f32 %v317_v20, %v316_v18 }
 0x1e6   :  { %583 = vrcp.f32 %v318_v21 }
 0x1ef   :  { %v582_v22 = vpop.eup %581 }
 0x1f0   :  { %v321_v23 = vmul.f32 0.17677669, %v582_v22 }
 0x1f2   :  { %v323_v24 = vmul.f32 %v578_v5, %v321_v23 }
 0x1f3   :  { %v584_v25 = vpop.eup %583 }
 0x1f4   :  { %v325_v26 = vpack.c.bf16 %v323_v24, %v323_v24  ;;  %v322_v27 = vmul.f32 0.17677669, %v584_v25 }
 0x1f6   :  { %550 = vmatmul.mubr.msk.bf16.vlgmr.msra.gmra.mxu0 %vm284_vm3, %v325_v26  ;;  %v324_v28 = vmul.f32 %v580_v8, %v322_v27 }
 0x1f8   :  { %v326_v29 = vpack.c.bf16 %v324_v28, %v324_v28 }
 0x1fa   :  { %556 = vmatmul.mubr.msk.bf16.vlgmr.msra.gmra.mxu1 %vm284_vm3, %v326_v29 }
 0x2b6   :  { %v368_v30 = vpop.f32.mrf.mxu0 }
 0x2b7   :  { %420 = vadd.xlane.f32.xlu0 %v368_v30 }
 0x2b8   :  { %v551_v31 = vpop.f32.mrf.mxu0 }
 0x2ba   :  { %v371_v32 = vpop.f32.mrf.mxu0  ;;  %v414_v33 = vpop.f32.mrf.mxu1 }
 0x2bb   :  { %422 = vadd.xlane.f32.xlu0 %v414_v33 }
 0x2bc   :  { %v552_v34 = vpop.f32.mrf.mxu0  ;;  %v557_v35 = vpop.f32.mrf.mxu1 }
 0x2be   :  { %v417_v36 = vpop.f32.mrf.mxu1 }
 0x2c0   :  { %v558_v37 = vpop.f32.mrf.mxu1 }
 0x340   :  { %v421_v39 = vpop.xlane.xlu0 %420 }
 0x341   :  { %v424_v40 = vmul.f32 0.03125, %v421_v39 }
 0x343   :  { %v426_v42 = vsub.f32 %v368_v30, %v424_v40 }
 0x344   :  { %v423_v43 = vpop.xlane.xlu0 %422 }
 0x345   :  { %v425_v44 = vmul.f32 0.03125, %v423_v43  ;;  %v433_v45 = vmul.f32 %v513_v41, %v426_v42 }
 0x347   :  { %v427_v46 = vsub.f32 %v414_v33, %v425_v44  ;;  %v435_v47 = vmul.f32 %v433_v45, %v433_v45 }
 0x349   :  { %437 = vadd.xlane.f32.xlu1 %v435_v47  ;;  %v434_v48 = vmul.f32 %v513_v41, %v427_v46 }
 0x34b   :  { %v436_v49 = vmul.f32 %v434_v48, %v434_v48 }
 0x34d   :  { %439 = vadd.xlane.f32.xlu1 %v436_v49 }
 0x3d2   :  { %v438_v50 = vpop.xlane.xlu1 %437 }
 0x3d3   :  { %v441_v51 = vmul.f32 0.03125, %v438_v50 }
 0x3d5   :  { %v443_v52 = vadd.f32 1e-05, %v441_v51 }
 0x3d6   :  { %v440_v53 = vpop.xlane.xlu1 %439 }
 0x3d7   :  { %585 = vrsqrt.f32 %v443_v52  ;;  %v442_v11 = vmul.f32 0.03125, %v440_v53 }
 0x3d9   :  { %v444_v54 = vadd.f32 1e-05, %v442_v11 }
 0x3db   :  { %587 = vrsqrt.f32 %v444_v54 }
 0x3e4   :  { %v586_v55 = vpop.eup %585 }
 0x3e5   :  { %v447_v56 = vmul.f32 %v586_v55, %v433_v45 }
 0x3e7   :  { %v456_v58 = vmul.f32 %v514_v1, %v447_v56 }
 0x3e8   :  { %v588_v59 = vpop.eup %587 }
 0x3e9   :  { %v448_v60 = vmul.f32 %v588_v59, %v434_v48  ;;  %v465_v61 = vadd.f32 %v515_v57, %v456_v58 }
 0x3eb   :  { %v457_v62 = vmul.f32 %v514_v1, %v448_v60  ;;  %v467_v63 = vrot.slane %v465_v61, 4 }
 0x3ed   :  { %v466_v0 = vadd.f32 %v515_v57, %v457_v62  ;;  %v468_v2 = vadd.f32 %v467_v63, %v465_v61 }
 0x3ef   :  { %v469_v3 = vrot.slane %v468_v2, 2  ;;  %v473_v4 = vrot.slane %v466_v0, 4 }
 0x3f1   :  { %v470_v5 = vadd.f32 %v469_v3, %v468_v2  ;;  %v474_v6 = vadd.f32 %v473_v4, %v466_v0 }
 0x3f3   :  { %v471_v7 = vrot.slane %v470_v5, 1  ;;  %v475_v8 = vrot.slane %v474_v6, 2 }
 0x3f5   :  { %v476_v9 = vadd.f32 %v475_v8, %v474_v6  ;;  %v472_v10 = vadd.f32 %v471_v7, %v470_v5 }
 0x3f7   :  { %v477_v12 = vrot.slane %v476_v9, 1  ;;  %v479_v14 = vmul.f32 0.125, %v472_v10 }
 0x3f9   :  { %v478_v13 = vadd.f32 %v477_v12, %v476_v9 }
 0x3fb   :  { %v480_v15 = vmul.f32 0.125, %v478_v13 }
 0x3fd   :  { %v484_v16 = vsel %vm483_vm5, %v480_v15, %v479_v14 }
 0x3fe   :  { %486 = vst [vmem:[#allocation7] sm:$0x3] %v484_v16 }
 0x3ff   :  { %640 = shalt.err (!%p637_p0)
}
 0x400   :  { %496 = dma.vmem_to_hbm [thread:$0]  %s494_s4, 32, %s743_s5, [#allocation4]  }
 0x401   :  { %653 = dma.done.wait [#allocation4], 32  }
 0x402   :  { %654 = vsyncadd [#allocation4], 4294967264 }
 0x403   :  { %500 = vsyncpa [#allocation3], 1 }
 0x404   :  { %501 = vsyncpa [#allocation6], 1 }
 0x405   :  { %502 = vsyncpa [#allocation4], 1 }

</bundles_post_ra>
